<compile_context>
chip_gen: v7x
topology: tpu7x:2x2x1
jax: 0.10.0
libtpu: 0.0.40
codegen_flags: <defaults>
</compile_context>

<pallas_src>
import jax
import jax.numpy as jnp
from jax import lax
from jax.experimental import pallas as pl
from jax.experimental.pallas import tpu as pltpu

EPS = 1e-5
THETA = 0.7


# ---------------------------------------------------------------------------
# Pallas kernel: fused (branch1+branch2 matmul -> ReLU6) -> (1x1 matmul + shift
# -> ReLU6), computed transposed / lane-dense: channels on sublanes, M on lanes.
# ---------------------------------------------------------------------------
def _gem_fused_kernel(xT_ref, wbT_ref, wlT_ref, tl_ref, o_ref):
    # Stage 1: both branch 3x3 convs as one (2C, Kp) @ (Kp, Mt) matmul.
    # BN scale, conv bias and BN shift are all folded into wbT (bias via the
    # ones row of xT), so the fused op is just clip(matmul).
    # bf16 operands on the MXU, f32 accumulation.
    y = jnp.dot(wbT_ref[...], xT_ref[...], preferred_element_type=jnp.float32)
    y = jnp.clip(y, 0.0, 6.0)                                     # ReLU6
    # Stage 2: branch_last 1x1 conv + BN + ReLU6: (C, 2C) @ (2C, Mt).
    # Tiny matmul — kept in f32 on the MXU; a VPU broadcast-FMA form only pays
    # if C_out stays this small in production.
    z = jnp.dot(wlT_ref[...], y, preferred_element_type=jnp.float32)
    z = jnp.clip(z + tl_ref[...], 0.0, 6.0)
    o_ref[...] = z.astype(o_ref.dtype)


# ---------------------------------------------------------------------------
# Host-side helpers
# ---------------------------------------------------------------------------
def _fold_bn(gamma, beta, mean, var, conv_bias):
    s = gamma / jnp.sqrt(var + EPS)
    t = beta + (conv_bias - mean) * s
    return s, t


def _oihw_to_matmul(w_oihw):
    # (C_out, C_in, kh, kw) -> ((kh*kw*C_in), C_out) matching im2col (kh,kw,ci)
    co, ci, kh, kw = w_oihw.shape
    return jnp.transpose(w_oihw, (2, 3, 1, 0)).reshape(kh * kw * ci, co)


def _cross_weight_folded(w15, theta):
    # Equivalent single 3x3 kernel of Conv2d_Hori_Veri_Cross (theta*1x1 diff
    # conv folded exactly into the centre tap).
    co, ci = w15.shape[0], w15.shape[1]
    wc = jnp.zeros((co, ci, 3, 3), jnp.float32)
    wc = wc.at[:, :, 0, 1].set(w15[:, :, 0, 0])
    wc = wc.at[:, :, 1, 0].set(w15[:, :, 0, 1])
    wc = wc.at[:, :, 1, 1].set(w15[:, :, 0, 2])
    wc = wc.at[:, :, 1, 2].set(w15[:, :, 0, 3])
    wc = wc.at[:, :, 2, 1].set(w15[:, :, 0, 4])
    kdiff = jnp.sum(w15, axis=(2, 3))                 # (C_out, C_in)
    wc = wc.at[:, :, 1, 1].add(-theta * kdiff)
    return wc


def _pick_tile_m(M):
    """Largest 128-multiple tile (<=2048) that keeps >=2 grid steps if possible."""
    m128 = pl.cdiv(M, 128)                 # number of 128-lane groups
    if m128 <= 1:
        return 128                         # single step; nothing to split
    return 128 * min(16, max(1, m128 // 2))


# ---------------------------------------------------------------------------
# GEM forward (single fused Pallas call)
# ---------------------------------------------------------------------------
def gem_forward(x_nchw, p):
    N, C_in, H, W = x_nchw.shape
    C_out = p["w1"].shape[0]
    K = 9 * C_in                           # im2col rows
    Kp = ((K + 1 + 7) // 8) * 8            # +1 bias row, rounded to sublane 8

    # --- host-side im2col for the 3x3 / stride 2 / pad 1 convs, built directly
    #     in the transposed (K, M) layout so M lands on the lane axis.
    # TODO(synk): for production feature-map sizes, build the 9 taps in-kernel
    # (phase-split row bands + manual DMA) to remove the 9x HBM inflation.
    xp = jnp.pad(x_nchw, ((0, 0), (0, 0), (1, 1), (1, 1)))
    Ho = (H + 2 - 3) // 2 + 1
    Wo = (W + 2 - 3) // 2 + 1
    M = N * Ho * Wo
    cols = [xp[:, :, kh:kh + 2 * Ho:2, kw:kw + 2 * Wo:2]          # (N,Cin,Ho,Wo)
            for kh in range(3) for kw in range(3)]
    xT = jnp.stack(cols, axis=0)                                  # (9,N,Cin,Ho,Wo)
    xT = xT.transpose(0, 2, 1, 3, 4).reshape(K, M)                # (K, M)

    tile_m = _pick_tile_m(M)
    Mp = pl.cdiv(M, tile_m) * tile_m

    # padded, bf16, bias-row-augmented patch matrix (Kp, Mp)
    xTp = jnp.zeros((Kp, Mp), jnp.bfloat16)
    xTp = xTp.at[:K, :M].set(xT.astype(jnp.bfloat16))
    xTp = xTp.at[K, :M].set(1.0)                                  # bias row

    # --- fold both branch convs + BN (scale AND shift) into one bf16 weight ---
    s1, t1 = _fold_bn(p["bn1_g"], p["bn1_b"], p["bn1_m"], p["bn1_v"], p["b1"])
    w1 = _oihw_to_matmul(p["w1"])                                 # (K, C)
    wc = _cross_weight_folded(p["w2_15"], THETA)
    s2, t2 = _fold_bn(p["bn2_g"], p["bn2_b"], p["bn2_m"], p["bn2_v"],
                      jnp.zeros((C_out,), jnp.float32))
    w2 = _oihw_to_matmul(wc)                                      # (K, C)
    wb = jnp.concatenate([w1 * s1[None, :], w2 * s2[None, :]], axis=1)  # (K,2C)
    tb = jnp.concatenate([t1, t2])                                # (2C,)
    wbT = jnp.zeros((2 * C_out, Kp), jnp.float32)
    wbT = wbT.at[:, :K].set(wb.T)
    wbT = wbT.at[:, K].set(tb)                                    # folded shift
    wbT = wbT.astype(jnp.bfloat16)                                # (2C, Kp)

    # --- fold branch_last (1x1 conv + BN); tiny, stays f32 ---
    sl, tl = _fold_bn(p["bnl_g"], p["bnl_b"], p["bnl_m"], p["bnl_v"], p["bl"])
    wlT = (_oihw_to_matmul(p["wl"]) * sl[None, :]).T.astype(jnp.float32)  # (C,2C)
    tl2 = tl.reshape(C_out, 1).astype(jnp.float32)

    oT = pl.pallas_call(
        _gem_fused_kernel,
        out_shape=jax.ShapeDtypeStruct((C_out, Mp), jnp.float32),
        grid=(Mp // tile_m,),
        in_specs=[
            pl.BlockSpec((Kp, tile_m), lambda i: (0, i)),
            pl.BlockSpec((2 * C_out, Kp), lambda i: (0, 0)),
            pl.BlockSpec((C_out, 2 * C_out), lambda i: (0, 0)),
            pl.BlockSpec((C_out, 1), lambda i: (0, 0)),
        ],
        out_specs=pl.BlockSpec((C_out, tile_m), lambda i: (0, i)),
        compiler_params=pltpu.CompilerParams(
            dimension_semantics=("parallel",)),
    )(xTp, wbT, wlT, tl2)

    # interior of the padding=1 1x1 conv output, already NCHW-ordered
    interior = oT[:, :M].reshape(C_out, N, Ho, Wo).transpose(1, 0, 2, 3)
    # border rows/cols of branch_last see the zero-padded `cat`, so the output
    # there is the per-channel constant relu6(shift).
    Hl, Wl = Ho + 2, Wo + 2
    border = jnp.clip(tl, 0.0, 6.0)
    out = jnp.broadcast_to(border[None, :, None, None], (N, C_out, Hl, Wl))
    out = out.at[:, :, 1:-1, 1:-1].set(interior)
    return out                                                    # NCHW


# ---------------------------------------------------------------------------
# Pure-JAX reference (literal translation of the PyTorch forward, f32)
# ---------------------------------------------------------------------------
def gem_ref(x, p):
    dn = ("NCHW", "OIHW", "NCHW")

    def bn_relu6(y, g, b, m, v):
        y = (g[None, :, None, None] * (y - m[None, :, None, None])
             / jnp.sqrt(v + EPS)[None, :, None, None] + b[None, :, None, None])
        return jnp.clip(y, 0.0, 6.0)

    o1 = lax.conv_general_dilated(x, p["w1"], (2, 2), [(1, 1), (1, 1)],
                                  dimension_numbers=dn)
    o1 = bn_relu6(o1 + p["b1"][None, :, None, None],
                  p["bn1_g"], p["bn1_b"], p["bn1_m"], p["bn1_v"])

    w15 = p["w2_15"]
    co, ci = w15.shape[0], w15.shape[1]
    wc = jnp.zeros((co, ci, 3, 3), jnp.float32)
    wc = wc.at[:, :, 0, 1].set(w15[:, :, 0, 0])
    wc = wc.at[:, :, 1, 0].set(w15[:, :, 0, 1])
    wc = wc.at[:, :, 1, 1].set(w15[:, :, 0, 2])
    wc = wc.at[:, :, 1, 2].set(w15[:, :, 0, 3])
    wc = wc.at[:, :, 2, 1].set(w15[:, :, 0, 4])
    on = lax.conv_general_dilated(x, wc, (2, 2), [(1, 1), (1, 1)],
                                  dimension_numbers=dn)
    kdiff = jnp.sum(w15, axis=(2, 3))[:, :, None, None]
    od = lax.conv_general_dilated(x, kdiff, (2, 2), [(0, 0), (0, 0)],
                                  dimension_numbers=dn)
    o2 = bn_relu6(on - THETA * od,
                  p["bn2_g"], p["bn2_b"], p["bn2_m"], p["bn2_v"])

    cat = jnp.concatenate([o1, o2], axis=1)
    ol = lax.conv_general_dilated(cat, p["wl"], (1, 1), [(1, 1), (1, 1)],
                                  dimension_numbers=dn)
    ol = bn_relu6(ol + p["bl"][None, :, None, None],
                  p["bnl_g"], p["bnl_b"], p["bnl_m"], p["bnl_v"])
    return ol


# ---------------------------------------------------------------------------
# Deterministic synthetic parameters (shapes from GEM.__init__ defaults)
# ---------------------------------------------------------------------------
def init_gem_params(key, c_in=3, c_out=3):
    ks = jax.random.split(key, 16)
    f32 = jnp.float32
    p = {}
    p["w1"] = 0.1 * jax.random.normal(ks[0], (c_out, c_in, 3, 3), f32)
    p["b1"] = 0.1 * jax.random.normal(ks[1], (c_out,), f32)
    p["bn1_g"] = 1.0 + 0.1 * jax.random.normal(ks[2], (c_out,), f32)
    p["bn1_b"] = 0.1 * jax.random.normal(ks[3], (c_out,), f32)
    p["bn1_m"] = 0.1 * jax.random.normal(ks[4], (c_out,), f32)
    p["bn1_v"] = 0.9 + 0.2 * jax.random.uniform(ks[5], (c_out,), f32)
    p["w2_15"] = 0.1 * jax.random.normal(ks[6], (c_out, c_in, 1, 5), f32)  # CD conv, bias=False
    p["bn2_g"] = 1.0 + 0.1 * jax.random.normal(ks[7], (c_out,), f32)
    p["bn2_b"] = 0.1 * jax.random.normal(ks[8], (c_out,), f32)
    p["bn2_m"] = 0.1 * jax.random.normal(ks[9], (c_out,), f32)
    p["bn2_v"] = 0.9 + 0.2 * jax.random.uniform(ks[10], (c_out,), f32)
    p["wl"] = 0.1 * jax.random.normal(ks[11], (c_out, 2 * c_out, 1, 1), f32)
    p["bl"] = 0.1 * jax.random.normal(ks[12], (c_out,), f32)
    p["bnl_g"] = 1.0 + 0.1 * jax.random.normal(ks[13], (c_out,), f32)
    p["bnl_b"] = 0.1 * jax.random.normal(ks[14], (c_out,), f32)
    p["bnl_m"] = 0.1 * jax.random.normal(ks[15], (c_out,), f32)
    p["bnl_v"] = jnp.ones((c_out,), f32)
    return p


if __name__ == "__main__":
    key = jax.random.PRNGKey(0)
    kx, kp = jax.random.split(key)
    # GEM defaults: in_channels=3, out_channels=3; small spatial = 16x16, batch 2
    x = jax.random.normal(kx, (2, 3, 16, 16), jnp.float32)   # NCHW
    params = init_gem_params(kp, c_in=3, c_out=3)

    out = jax.jit(gem_forward)(x, params)
    out = jax.block_until_ready(out)

    ref = gem_ref(x, params)
    assert out.shape == (2, 3, 10, 10), out.shape            # 16 -> 8 (stride 2) -> 10 (1x1 conv, pad 1)
    # bf16 operands (f32 accumulation) -> relaxed tolerance vs the f32 reference
    assert jnp.allclose(out, ref, atol=3e-2, rtol=3e-2), "Pallas GEM mismatch vs reference"
    print("KERNEL_OK")
</pallas_src>

<mosaic_0001>
module attributes {stable_mosaic.version = 11 : i64} {
  func.func @_gem_fused_kernel(%arg0: i32, %arg1: memref<32x128xbf16, #tpu.memory_space<vmem>>, %arg2: memref<6x32xbf16, #tpu.memory_space<vmem>>, %arg3: memref<3x6xf32, #tpu.memory_space<vmem>>, %arg4: memref<3x1xf32, #tpu.memory_space<vmem>>, %arg5: memref<3x128xf32, #tpu.memory_space<vmem>>) attributes {dimension_semantics = [#tpu.dimension_semantics<parallel>], iteration_bounds = array<i64: 1>, scalar_prefetch = 0 : i64, scratch_operands = 0 : i64, tpu.core_type = #tpu.core_type<tc>, window_params = [{transform_indices = @transform_0, window_bounds = array<i64: 32, 128>}, {pipeline_mode = #tpu.pipeline_mode<synchronous>, transform_indices = @transform_1, window_bounds = array<i64: 6, 32>}, {pipeline_mode = #tpu.pipeline_mode<synchronous>, transform_indices = @transform_2, window_bounds = array<i64: 3, 6>}, {pipeline_mode = #tpu.pipeline_mode<synchronous>, transform_indices = @transform_3, window_bounds = array<i64: 3, 1>}, {transform_indices = @transform_4, window_bounds = array<i64: 3, 128>}]} {
    %c0 = arith.constant 0 : index
    %c0_0 = arith.constant 0 : index
    %0 = vector.load %arg2[%c0, %c0_0] : memref<6x32xbf16, #tpu.memory_space<vmem>>, vector<6x32xbf16>
    %c0_1 = arith.constant 0 : index
    %c0_2 = arith.constant 0 : index
    %1 = vector.load %arg1[%c0_1, %c0_2] : memref<32x128xbf16, #tpu.memory_space<vmem>>, vector<32x128xbf16>
    %cst = arith.constant dense<0.000000e+00> : vector<6x128xf32>
    %2 = tpu.matmul %0, %1, %cst {dimension_numbers = #tpu.dot_dimension_numbers<[1], [0], [0], [1], [0, 0, 1, 1], [], []>} : vector<6x32xbf16>, vector<32x128xbf16>, vector<6x128xf32> -> vector<6x128xf32>
    %cst_3 = arith.constant 0.000000e+00 : f32
    %cst_4 = arith.constant 6.000000e+00 : f32
    %3 = vector.broadcast %cst_3 : f32 to vector<6x128xf32>
    %4 = arith.maximumf %3, %2 : vector<6x128xf32>
    %5 = vector.broadcast %cst_4 : f32 to vector<6x128xf32>
    %6 = arith.minimumf %5, %4 : vector<6x128xf32>
    %c0_5 = arith.constant 0 : index
    %c0_6 = arith.constant 0 : index
    %7 = vector.load %arg3[%c0_5, %c0_6] : memref<3x6xf32, #tpu.memory_space<vmem>>, vector<3x6xf32>
    %cst_7 = arith.constant dense<0.000000e+00> : vector<3x128xf32>
    %8 = tpu.matmul %7, %6, %cst_7 {dimension_numbers = #tpu.dot_dimension_numbers<[1], [0], [0], [1], [0, 0, 1, 1], [], []>} : vector<3x6xf32>, vector<6x128xf32>, vector<3x128xf32> -> vector<3x128xf32>
    %c0_8 = arith.constant 0 : index
    %c0_9 = arith.constant 0 : index
    %9 = vector.load %arg4[%c0_8, %c0_9] : memref<3x1xf32, #tpu.memory_space<vmem>>, vector<3x1xf32>
    %10 = vector.broadcast %9 : vector<3x1xf32> to vector<3x128xf32>
    %11 = arith.addf %8, %10 : vector<3x128xf32>
    %cst_10 = arith.constant 0.000000e+00 : f32
    %cst_11 = arith.constant 6.000000e+00 : f32
    %12 = vector.broadcast %cst_10 : f32 to vector<3x128xf32>
    %13 = arith.maximumf %12, %11 : vector<3x128xf32>
    %14 = vector.broadcast %cst_11 : f32 to vector<3x128xf32>
    %15 = arith.minimumf %14, %13 : vector<3x128xf32>
    %c0_12 = arith.constant 0 : index
    %c0_13 = arith.constant 0 : index
    %16 = vector.load %arg5[%c0_12, %c0_13] : memref<3x128xf32, #tpu.memory_space<vmem>>, vector<3x128xf32>
    tpu.vector_store %arg5[%c0_12, %c0_13], %15 {strides = array<i32>} : memref<3x128xf32, #tpu.memory_space<vmem>>, vector<3x128xf32>,
    return
  }
  func.func @transform_0(%arg0: i32) -> (i32, i32) {
    %c0_i32 = arith.constant 0 : i32
    %c0_i32_0 = arith.constant 0 : i32
    return %c0_i32, %arg0 : i32, i32
  }
  func.func @transform_1(%arg0: i32) -> (i32, i32) {
    %c0_i32 = arith.constant 0 : i32
    %c0_i32_0 = arith.constant 0 : i32
    %c0_i32_1 = arith.constant 0 : i32
    return %c0_i32, %c0_i32_0 : i32, i32
  }
  func.func @transform_2(%arg0: i32) -> (i32, i32) {
    %c0_i32 = arith.constant 0 : i32
    %c0_i32_0 = arith.constant 0 : i32
    %c0_i32_1 = arith.constant 0 : i32
    return %c0_i32, %c0_i32_0 : i32, i32
  }
  func.func @transform_3(%arg0: i32) -> (i32, i32) {
    %c0_i32 = arith.constant 0 : i32
    %c0_i32_0 = arith.constant 0 : i32
    %c0_i32_1 = arith.constant 0 : i32
    return %c0_i32, %c0_i32_0 : i32, i32
  }
  func.func @transform_4(%arg0: i32) -> (i32, i32) {
    %c0_i32 = arith.constant 0 : i32
    %c0_i32_0 = arith.constant 0 : i32
    return %c0_i32, %arg0 : i32, i32
  }
}

</mosaic_0001>

<bundles_post_ra>
// kernel: gem_forward.1
= control target key start
LH: loop header
LB: loop body
LE: loop exit
PB: predicated region body
PF: predicated region fallthrough
CT: control target
= control target key end

     0   :  { %v202_v0 = vmov 0.0   ;;  %vm203_vm0 = vmmov 0   ;;  %vm35_vm1 = vcmask 261120   ;;  %v204_v4 = vmov 0   ;;  %s248_s0 = inlined_call_operand.vmem [shape: bf16[32,128], index: 0, kind: input, shape index: {}]   ;;  %s249_s1 = inlined_call_operand.vmem [shape: bf16[6,32], index: 1, kind: input, shape index: {}]   ;;  %s250_s3 = inlined_call_operand.vmem [shape: f32[3,1], index: 3, kind: input, shape index: {}]   ;;  %s251_s2 = inlined_call_operand.vmem [shape: f32[3,6], index: 2, kind: input, shape index: {}]   ;;  %s252_s4 = inlined_call_operand.vmem [shape: f32[3,128], index: 4, kind: output, shape index: {}]  }
   0x1   :  { %183 = vmatprep.subr.bf16.mxu0 %v202_v0  ;;  %v200_v1 = vld [vmem:[%s248_s0] sm:$0xff]   ;;  %187 = vmatprep.mubr.msk.bf16.mxu0 %vm203_vm0, %v202_v0  ;;  %v201_v2 = vld [vmem:[%s248_s0 + $0x8] sm:$0xff]   ;;  %vm92_vm2 = vcmask 1045504   ;;  %vm88_vm3 = vcmask 48128  }
   0x2   :  { %191 = vmatprep.subr.mxu1 %v202_v0  ;;  %193 = vmatprep.mubr.msk.f32.mxu1 %vm203_vm0, %v202_v0  ;;  %v18_v3 = vld [vmem:[%s249_s1] sm:$0x7] }
   0x3   :  { %184 = vmatpush3.bf16.msra.mxu0 %v200_v1  ;;  %199 = vset.pattern.permute.xlu0 %v204_v4  ;;  %v82_v5 = vld [vmem:[%s250_s3] sm:$0x7] }
   0x4   :  { %185 = vmatprep.subr.bf16.mxu0 %v202_v0  ;;  %85 = vperm.xlu0 %199, %v82_v5   ;;  %v81_v12 = vld [vmem:[%s251_s2] sm:$0x7] }
   0x7   :  { %186 = vmatpush3.bf16.msra.mxu0 %v201_v2 }
   0xa   :  { %188 = vmatmul.mubr.msk.bf16.vlgmr.msra.gmra.mrb[0].mxu0 %vm35_vm1, %v18_v3 }
  0x83   :  { %v86_v13 = vpop.permute.xlu0 %85 }
  0xdd   :  { %v73_v6 = vpop.f32.mrb[0].mxu0 }
  0xde   :  { %v79_v7 = vmax.f32 %v73_v6, 0.0  ;;  %v189_v8 = vpop.f32.mrb[1].mxu0 }
  0xdf   :  { %v76_v9 = vpop.f32.mrb[2].mxu0 }
  0xe0   :  { %v80_v10 = vmin.f32 %v79_v7, 6.0  ;;  %v190_v11 = vpop.f32.mrb[3].mxu0 }
  0xe2   :  { %192 = vmatpush3.msk.msra.mxu1 %vm92_vm2, %v80_v10 }
  0xe3   :  { %194 = vmatmul.mubr.msk.f32.vlgmr.msra.gmra.mrb[0].mxu1 %vm88_vm3, %v81_v12 }
 0x1b6   :  { %v162_v14 = vpop.f32.mrb[0].mxu1 }
 0x1b7   :  { %v163_v15 = vadd.f32 %v162_v14, %v86_v13  ;;  %v195_v16 = vpop.f32.mrb[1].mxu1 }
 0x1b9   :  { %v166_v17 = vmax.f32 %v163_v15, 0.0 }
 0x1bb   :  { %v167_v18 = vmin.f32 %v166_v17, 6.0 }
 0x1bd   :  { %168 = vst [vmem:[%s252_s4] sm:$0x7] %v167_v18 }

</bundles_post_ra>
